<compile_context>
chip_gen: v7x
topology: tpu7x:2x2x1
jax: 0.10.0
libtpu: 0.0.40
codegen_flags: <defaults>
</compile_context>

<pallas_src>
import jax
import jax.numpy as jnp
from jax.experimental import pallas as pl
from jax.experimental.pallas import tpu as pltpu


_INV_SQRT2 = 0.7071067811865476  # 1/sqrt(2) for exact-erf GELU


# ----------------------------- Pallas kernel ------------------------------ #
def _freq_processor_kernel(xT_ref, w1T_ref, w2T_ref, b2_ref, o_ref):
    # xT_ref : (d_in+1, TR)  column tile of [x^T ; ones] (bias-fold row)
    # w1T_ref: (hidden, d_in+1) = [softmax(w) folded W1^T | b1]
    # w2T_ref: (d_out, hidden)
    # b2_ref : (d_out, 1)
    # o_ref  : (d_out, TR)   lane-dense output tile
    hT = jnp.dot(w1T_ref[...], xT_ref[...],
                 preferred_element_type=jnp.float32)
    # Exact (erf) GELU, matching torch.nn.GELU default, on lane-dense vregs.
    hT = 0.5 * hT * (1.0 + jax.lax.erf(hT * _INV_SQRT2))

    # Dropout -> identity (eval semantics)

    outT = jnp.dot(w2T_ref[...], hT,
                   preferred_element_type=jnp.float32) + b2_ref[...]
    o_ref[...] = outT.astype(o_ref.dtype)


# ------------------------------ Host wrapper ------------------------------ #
def dynamic_frequency_processor(x, freq_importance, w1, b1, w2, b2,
                                *, row_tile=4096):
    """
    Args:
      x:               (batch, pairs, input_dim) float32
      freq_importance: (input_dim,) float32
      w1: (input_dim, hidden) float32     b1: (hidden,) float32
      w2: (hidden, output_dim) float32    b2: (output_dim,) float32
    Returns:
      (batch, pairs, output_dim) float32
    """
    batch, pairs, d_in = x.shape
    hidden = w1.shape[1]
    d_out = w2.shape[1]
    rows = batch * pairs
    f32 = jnp.float32

    # --- Host-side weight prep (batch-independent, done once) -------------- #
    # Fold softmax(frequency_importance) and b1 into an augmented W1^T:
    #   (hidden, d_in+1) = [ (diag(softmax(fi)) @ W1)^T | b1 ]
    freq_w = jax.nn.softmax(freq_importance.astype(f32), axis=0)
    w1T_aug = jnp.concatenate(
        [(w1.astype(f32) * freq_w[:, None]).T, b1.astype(f32)[:, None]], axis=1)
    w2T = w2.astype(f32).T               # (d_out, hidden)
    b2_col = b2.astype(f32)[:, None]     # (d_out, 1)

    # x^T with an appended ones row (bias-fold column for b1): (d_in+1, rows)
    xT = x.reshape(rows, d_in).astype(f32).T
    xT_aug = jnp.concatenate([xT, jnp.ones((1, rows), f32)], axis=0)

    # --- Lane (row) tiling -------------------------------------------------- #
    # Tiny inputs: single full-extent block (tiling is pure overhead and a
    # block last-dim equal to the array extent is always layout-legal).
    # Larger inputs: aim for >=4 grid steps (2-TC sharding on v7x + DMA/compute
    # overlap), tile rounded up to the 128-lane granule, capped by row_tile.
    if rows <= 512:
        tr = rows
    else:
        tr = ((rows + 3) // 4 + 127) // 128 * 128
        tr = min(tr, row_tile)
    grid = (pl.cdiv(rows, tr),)

    # Per-step VMEM (f32, double-buffered): xT tile ~ (24-sublane pad)*tr*4 B,
    # out tile d_out*tr*4 B, weights ~ few KiB -> well under the scoped default
    # on v5e/v6e/v7x at tr=4096.
    outT = pl.pallas_call(
        _freq_processor_kernel,
        out_shape=jax.ShapeDtypeStruct((d_out, rows), x.dtype),
        grid=grid,
        in_specs=[
            pl.BlockSpec((d_in + 1, tr), lambda i: (0, i)),      # streamed x^T
            pl.BlockSpec((hidden, d_in + 1), lambda i: (0, 0)),  # resident W1a^T
            pl.BlockSpec((d_out, hidden), lambda i: (0, 0)),     # resident W2^T
            pl.BlockSpec((d_out, 1), lambda i: (0, 0)),          # resident b2
        ],
        out_specs=pl.BlockSpec((d_out, tr), lambda i: (0, i)),   # lane-dense out^T
        compiler_params=pltpu.CompilerParams(
            dimension_semantics=("parallel",),   # shard row tiles across TCs (v7x)
        ),
    )(xT_aug, w1T_aug, w2T, b2_col)

    return outT.T.reshape(batch, pairs, d_out)


# ------------------------------ Reference (JAX) ---------------------------- #
def _reference(x, freq_importance, w1, b1, w2, b2):
    w = jax.nn.softmax(freq_importance, axis=0)
    xw = x * w[None, None, :]
    h = xw @ w1 + b1
    h = jax.nn.gelu(h, approximate=False)
    return h @ w2 + b2


if __name__ == "__main__":
    # Config (mirrors freq_config): input_dim=20, hidden_dims=[32], output_dim=16
    input_dim, hidden_dim, output_dim = 20, 32, 16

    key = jax.random.PRNGKey(0)
    k_x, k_w1, k_b1, k_w2, k_b2, k_x2 = jax.random.split(key, 6)

    # frequency_importance initialized to ones, as in the module's __init__
    freq_importance = jnp.ones((input_dim,), dtype=jnp.float32)

    # Deterministic Linear-layer params (uniform, roughly Kaiming-scaled)
    lim1 = 1.0 / (input_dim ** 0.5)
    w1 = jax.random.uniform(k_w1, (input_dim, hidden_dim), jnp.float32, -lim1, lim1)
    b1 = jax.random.uniform(k_b1, (hidden_dim,), jnp.float32, -lim1, lim1)
    lim2 = 1.0 / (hidden_dim ** 0.5)
    w2 = jax.random.uniform(k_w2, (hidden_dim, output_dim), jnp.float32, -lim2, lim2)
    b2 = jax.random.uniform(k_b2, (output_dim,), jnp.float32, -lim2, lim2)

    # --- Small case (single-block path) ------------------------------------ #
    batch, pairs = 2, 8
    x = jax.random.normal(k_x, (batch, pairs, input_dim), dtype=jnp.float32)
    out = jax.block_until_ready(
        dynamic_frequency_processor(x, freq_importance, w1, b1, w2, b2))
    ref = _reference(x, freq_importance, w1, b1, w2, b2)
    assert out.shape == (batch, pairs, output_dim)
    assert jnp.allclose(out, ref, atol=1e-4, rtol=1e-4), "small-case mismatch"

    # --- Larger case (multi-step grid + partial last lane tile) ------------- #
    batch2, pairs2 = 4, 300   # rows = 1200 -> 4 grid steps, last tile partial
    x2 = jax.random.normal(k_x2, (batch2, pairs2, input_dim), dtype=jnp.float32)
    out2 = jax.block_until_ready(
        dynamic_frequency_processor(x2, freq_importance, w1, b1, w2, b2))
    ref2 = _reference(x2, freq_importance, w1, b1, w2, b2)
    assert out2.shape == (batch2, pairs2, output_dim)
    assert jnp.allclose(out2, ref2, atol=1e-4, rtol=1e-4), "tiled-case mismatch"

    print("KERNEL_OK")
</pallas_src>

<mosaic_0001>
module attributes {stable_mosaic.version = 11 : i64} {
  func.func @_freq_processor_kernel(%arg0: i32, %arg1: memref<21x16xf32, #tpu.memory_space<vmem>>, %arg2: memref<32x21xf32, #tpu.memory_space<vmem>>, %arg3: memref<16x32xf32, #tpu.memory_space<vmem>>, %arg4: memref<16x1xf32, #tpu.memory_space<vmem>>, %arg5: memref<16x16xf32, #tpu.memory_space<vmem>>) attributes {dimension_semantics = [#tpu.dimension_semantics<parallel>], iteration_bounds = array<i64: 1>, scalar_prefetch = 0 : i64, scratch_operands = 0 : i64, tpu.core_type = #tpu.core_type<tc>, window_params = [{transform_indices = @transform_0, window_bounds = array<i64: 21, 16>}, {pipeline_mode = #tpu.pipeline_mode<synchronous>, transform_indices = @transform_1, window_bounds = array<i64: 32, 21>}, {pipeline_mode = #tpu.pipeline_mode<synchronous>, transform_indices = @transform_2, window_bounds = array<i64: 16, 32>}, {pipeline_mode = #tpu.pipeline_mode<synchronous>, transform_indices = @transform_3, window_bounds = array<i64: 16, 1>}, {transform_indices = @transform_4, window_bounds = array<i64: 16, 16>}]} {
    %c0 = arith.constant 0 : index
    %c0_0 = arith.constant 0 : index
    %0 = vector.load %arg2[%c0, %c0_0] : memref<32x21xf32, #tpu.memory_space<vmem>>, vector<32x21xf32>
    %c0_1 = arith.constant 0 : index
    %c0_2 = arith.constant 0 : index
    %1 = vector.load %arg1[%c0_1, %c0_2] : memref<21x16xf32, #tpu.memory_space<vmem>>, vector<21x16xf32>
    %cst = arith.constant dense<0.000000e+00> : vector<32x16xf32>
    %2 = tpu.matmul %0, %1, %cst {dimension_numbers = #tpu.dot_dimension_numbers<[1], [0], [0], [1], [0, 0, 1, 1], [], []>} : vector<32x21xf32>, vector<21x16xf32>, vector<32x16xf32> -> vector<32x16xf32>
    %cst_3 = arith.constant 5.000000e-01 : f32
    %3 = vector.broadcast %cst_3 : f32 to vector<32x16xf32>
    %4 = arith.mulf %3, %2 : vector<32x16xf32>
    %cst_4 = arith.constant 0.707106769 : f32
    %5 = vector.broadcast %cst_4 : f32 to vector<32x16xf32>
    %6 = arith.mulf %2, %5 : vector<32x16xf32>
    %7 = math.erf %6 : vector<32x16xf32>
    %cst_5 = arith.constant 1.000000e+00 : f32
    %8 = vector.broadcast %cst_5 : f32 to vector<32x16xf32>
    %9 = arith.addf %8, %7 : vector<32x16xf32>
    %10 = arith.mulf %4, %9 : vector<32x16xf32>
    %c0_6 = arith.constant 0 : index
    %c0_7 = arith.constant 0 : index
    %11 = vector.load %arg3[%c0_6, %c0_7] : memref<16x32xf32, #tpu.memory_space<vmem>>, vector<16x32xf32>
    %cst_8 = arith.constant dense<0.000000e+00> : vector<16x16xf32>
    %12 = tpu.matmul %11, %10, %cst_8 {dimension_numbers = #tpu.dot_dimension_numbers<[1], [0], [0], [1], [0, 0, 1, 1], [], []>} : vector<16x32xf32>, vector<32x16xf32>, vector<16x16xf32> -> vector<16x16xf32>
    %c0_9 = arith.constant 0 : index
    %c0_10 = arith.constant 0 : index
    %13 = vector.load %arg4[%c0_9, %c0_10] : memref<16x1xf32, #tpu.memory_space<vmem>>, vector<16x1xf32>
    %14 = vector.broadcast %13 : vector<16x1xf32> to vector<16x16xf32>
    %15 = arith.addf %12, %14 : vector<16x16xf32>
    %c0_11 = arith.constant 0 : index
    %c0_12 = arith.constant 0 : index
    %16 = vector.load %arg5[%c0_11, %c0_12] : memref<16x16xf32, #tpu.memory_space<vmem>>, vector<16x16xf32>
    tpu.vector_store %arg5[%c0_11, %c0_12], %15 {strides = array<i32>} : memref<16x16xf32, #tpu.memory_space<vmem>>, vector<16x16xf32>,
    return
  }
  func.func @transform_0(%arg0: i32) -> (i32, i32) {
    %c0_i32 = arith.constant 0 : i32
    %c0_i32_0 = arith.constant 0 : i32
    return %c0_i32, %arg0 : i32, i32
  }
  func.func @transform_1(%arg0: i32) -> (i32, i32) {
    %c0_i32 = arith.constant 0 : i32
    %c0_i32_0 = arith.constant 0 : i32
    %c0_i32_1 = arith.constant 0 : i32
    return %c0_i32, %c0_i32_0 : i32, i32
  }
  func.func @transform_2(%arg0: i32) -> (i32, i32) {
    %c0_i32 = arith.constant 0 : i32
    %c0_i32_0 = arith.constant 0 : i32
    %c0_i32_1 = arith.constant 0 : i32
    return %c0_i32, %c0_i32_0 : i32, i32
  }
  func.func @transform_3(%arg0: i32) -> (i32, i32) {
    %c0_i32 = arith.constant 0 : i32
    %c0_i32_0 = arith.constant 0 : i32
    %c0_i32_1 = arith.constant 0 : i32
    return %c0_i32, %c0_i32_0 : i32, i32
  }
  func.func @transform_4(%arg0: i32) -> (i32, i32) {
    %c0_i32 = arith.constant 0 : i32
    %c0_i32_0 = arith.constant 0 : i32
    return %c0_i32, %arg0 : i32, i32
  }
}

</mosaic_0001>

<bundles_post_ra>
// kernel: tpu_custom_call.1
= control target key start
LH: loop header
LB: loop body
LE: loop exit
PB: predicated region body
PF: predicated region fallthrough
CT: control target
= control target key end

     0   :  { %vm25_vm0 = vcmask 171008   ;;  %vm38_vm1 = vcmask 1044480   ;;  %s434_s0 = inlined_call_operand.vmem [shape: f32[21,16], index: 0, kind: input, shape index: {}]   ;;  %s435_s1 = inlined_call_operand.vmem [shape: f32[32,21], index: 1, kind: input, shape index: {}]   ;;  %s436_s2 = inlined_call_operand.vmem [shape: f32[16,32], index: 2, kind: input, shape index: {}]   ;;  %s437_s3 = inlined_call_operand.vmem [shape: f32[16,1], index: 3, kind: input, shape index: {}]   ;;  %s438_s4 = inlined_call_operand.hbm [shape: f32[16,16], index: 4, kind: output, shape index: {}]  }
   0x1   :  { %v22_v0 = vld [vmem:[%s434_s0] sm:$0xff]  ;;  %v23_v1 = vld [vmem:[%s434_s0 + $0x8] sm:$0xff]  ;;  %v24_v4 = vld [vmem:[%s434_s0 + $0x10] sm:$0x1f] }
   0x2   :  { %v305_v2 = vpack.c.bf16 %v23_v1, %v22_v0  ;;  %v18_v3 = vld [vmem:[%s435_s1] sm:$0xff] }
   0x3   :  { %288 = vmatprep.mubr.msk.f32.mxu0 %vm25_vm0, %v18_v3 }
   0x4   :  { %9 = vsyncpa [#allocation3], 0  ;;  %306 = vmatprep.subr.bf16.mxu0 %v305_v2  ;;  %v19_v5 = vld [vmem:[%s435_s1 + $0x8] sm:$0xff]  ;;  %v20_v6 = vld [vmem:[%s435_s1 + $0x10] sm:$0xff]  ;;  %vm161_vm2 = vcmask 261120   ;;  %v354_v10 = vmov 0  }
   0x5   :  { %308 = vmatpush3.bf16.msra.mxu0 %v305_v2  ;;  %v21_v7 = vld [vmem:[%s435_s1 + $0x18] sm:$0xff]  ;;  %v147_v8 = vld [vmem:[%s436_s2] sm:$0xff]  ;;  %321 = vset.pattern.permute.xlu0 %v354_v10  ;;  %v150_v11 = vld [vmem:[%s437_s3 + $0x8] sm:$0xff]  ;;  %s355_s8 = smov [#allocation2]   ;;  %vm243_vm3 = vcmask 130048  }
   0x6   :  { %286 = vmatprep.subr.msk.mxu0 %vm38_vm1, %v24_v4  ;;  %302 = vmatprep.mubr.msk.f32.mxu1 %vm161_vm2, %v147_v8  ;;  %v149_v9 = vld [vmem:[%s437_s3] sm:$0xff]  ;;  %v148_v38 = vld [vmem:[%s436_s2 + $0x8] sm:$0xff]  ;;  %s251_s9 = sshll.u32 %s355_s8, 4  ;;  %s252_s9 = int_to_ptr.vmem [resolvable:$true] %s251_s9 }
   0x7   :  { %153 = vperm.xlu0 %321, %v149_v9   ;;  %s330_s10 = scalar_lea.vmem %s252_s9, 256  ;;  %p335_p1 = scmp.lt.s32.totalorder %s252_s9, %s252_s9 }
   0x8   :  { %p331_p0 = scmp.ne.s32.totalorder %s252_s9, %s330_s10  ;;  %p336_p2 = scmp.lt.s32.totalorder %s330_s10, %s330_s10 }
   0x9   :  { %287 = vmatpush3.msk.msra.mxu0 %vm38_vm1, %v24_v4 }
   0xa   :  { %289 = vmatmul.mubr.msk.f32.vlgmr.msra.gmra.mrb[0].mxu0 %vm25_vm0, %v19_v5  ;;  %p337_p3 = por %p336_p2, %p335_p1 }
   0xb   :  { %291 = vmatprep.mubr.msk.f32.mxu0 %vm25_vm0, %v20_v6  ;;  %158 = vperm.xlu0 %321, %v150_v11  }
   0xc   :  { %p338_p4 = pnand %p337_p3, %p331_p0 }
   0xe   :  { %292 = vmatmul.mubr.msk.f32.gmra.mrb[2].mxu0 %vm25_vm0, %v21_v7 }
  0x86   :  { %v154_v39 = vpop.permute.xlu0 %153 }
  0x8a   :  { %v159_v40 = vpop.permute.xlu0 %158 }
  0xdd   :  { %v290_v12 = vpop.f32.mrb[0].mxu0 }
  0xde   :  { %v132_v13 = vmul.f32 0.70710677, %v290_v12  ;;  %v108_v14 = vpop.f32.mrb[1].mxu0  ;;  %v128_v22 = vmul.f32 0.5, %v290_v12 }
  0xdf   :  { %v131_v15 = vmul.f32 0.70710677, %v108_v14  ;;  %v127_v24 = vmul.f32 0.5, %v108_v14 }
  0xe0   :  { %322 = verf.f32 %v132_v13 }
  0xe1   :  { %324 = verf.f32 %v131_v15  ;;  %v293_v16 = vpop.f32.mrb[2].mxu0 }
  0xe2   :  { %v134_v17 = vmul.f32 0.70710677, %v293_v16  ;;  %v118_v18 = vpop.f32.mrb[3].mxu0  ;;  %v130_v30 = vmul.f32 0.5, %v293_v16 }
  0xe3   :  { %v133_v19 = vmul.f32 0.70710677, %v118_v18  ;;  %v129_v32 = vmul.f32 0.5, %v118_v18 }
  0xe4   :  { %326 = verf.f32 %v134_v17 }
  0xe5   :  { %328 = verf.f32 %v133_v19 }
  0xea   :  { %v323_v20 = vpop.eup %322 }
  0xeb   :  { %v325_v21 = vpop.eup %324  ;;  %v140_v23 = vadd.f32 1.0, %v323_v20 }
  0xec   :  { %v139_v25 = vadd.f32 1.0, %v325_v21 }
  0xed   :  { %v144_v26 = vmul.f32 %v140_v23, %v128_v22 }
  0xee   :  { %v327_v27 = vpop.eup %326  ;;  %v143_v28 = vmul.f32 %v139_v25, %v127_v24 }
  0xef   :  { %v329_v29 = vpop.eup %328  ;;  %v142_v31 = vadd.f32 1.0, %v327_v27 }
  0xf0   :  { %v141_v33 = vadd.f32 1.0, %v329_v29  ;;  %v309_v34 = vpack.c.bf16 %v144_v26, %v143_v28 }
  0xf1   :  { %v146_v35 = vmul.f32 %v142_v31, %v130_v30 }
  0xf2   :  { %v145_v36 = vmul.f32 %v141_v33, %v129_v32  ;;  %310 = vmatprep.subr.bf16.mxu1 %v309_v34 }
  0xf3   :  { %312 = vmatpush3.bf16.msra.mxu1 %v309_v34 }
  0xf4   :  { %v313_v37 = vpack.c.bf16 %v146_v35, %v145_v36 }
  0xf6   :  { %314 = vmatprep.subr.bf16.mxu1 %v313_v37 }
  0xf7   :  { %316 = vmatpush3.bf16.msra.mxu1 %v313_v37 }
  0xfa   :  { %303 = vmatmul.mubr.msk.f32.vlgmr.msra.gmra.mrb[0].mxu1 %vm161_vm2, %v148_v38 }
 0x1cd   :  { %v304_v41 = vpop.f32.mrb[0].mxu1 }
 0x1ce   :  { %v240_v42 = vadd.f32 %v304_v41, %v159_v40  ;;  %v234_v43 = vpop.f32.mrb[1].mxu1 }
 0x1cf   :  { %v235_v44 = vadd.f32 %v234_v43, %v154_v39 }
 0x1d0   :  { %245 = vst.msk [vmem:[#allocation2 + $0x8] sm:$0xff] %vm243_vm3, %v240_v42 }
 0x1d1   :  { %244 = vst.msk [vmem:[#allocation2] sm:$0xff] %vm243_vm3, %v235_v44 }
 0x1d2   :  { %341 = shalt.err (!%p338_p4)
}
 0x1d3   :  { %s342_s12 = scalar_lea.hbm %s438_s4, 256 }
 0x1d4   :  { %p343_p5 = scmp.ne.s32.totalorder %s438_s4, %s342_s12  ;;  %p346_p6 = scmp.lt.u32.totalorder %s342_s12, %s438_s4 }
 0x1d6   :  { %p348_p7 = pnand %p346_p6, %p343_p5 }
 0x1d8   :  { %351 = shalt.err (!%p348_p7)
}
 0x1d9   :  { %s356_s17 = smov 128   ;;  %s357_s18 = smov 8  }
 0x1da   :  { %257 = dma.vmem_to_hbm [thread:$0]  %s252_s9, 256, %s438_s4, [#allocation3], %s356_s17, %s356_s17, %s357_s18  }
 0x1db   :  { %352 = dma.done.wait [#allocation3], 256  }
 0x1dc   :  { %353 = vsyncadd [#allocation3], 4294967040 }
 0x1dd   :  { %261 = vsyncpa [#allocation3], 1 }

</bundles_post_ra>
